<compile_context>
chip_gen: v6e
topology: v6e:2x2x1
jax: 0.10.0
libtpu: 0.0.40
codegen_flags: <defaults>
</compile_context>

<pallas_src>
import jax
import jax.numpy as jnp
from jax.experimental import pallas as pl
from jax.experimental.pallas import tpu as pltpu


# ----------------------------- in-kernel helpers ------------------------------

def _im2col(x, k):
    """x: (L, C) -> (L, k*C) with 'same' zero padding (odd k only)."""
    L, C = x.shape
    pad = (k - 1) // 2
    z = jnp.zeros((pad, C), x.dtype)
    xp = jnp.concatenate([z, x, z], axis=0)              # (L + k - 1, C)
    cols = [xp[i:i + L, :] for i in range(k)]            # static shifted slices
    return jnp.concatenate(cols, axis=-1)                # (L, k*C)


def _conv_relu(x, w_ref, b_ref, k):
    """'same' 1D conv as ONE im2col MXU matmul + bias + ReLU (f32 accumulation)."""
    lhs = _im2col(x, k).astype(jnp.bfloat16)             # bf16 MXU inputs
    acc = jnp.dot(lhs, w_ref[...], preferred_element_type=jnp.float32)
    return jnp.maximum(acc + b_ref[...], 0.0)            # f32 epilogue


def _maxpool2(x):
    """MaxPool1d(kernel=2, stride=2) on (L, C) -> (L//2, C)."""
    L, C = x.shape
    return jnp.max(x.reshape(L // 2, 2, C), axis=1)


# ------------------------------- fused kernel ---------------------------------

def multitask_kernel(x_ref,                               # (1, L, Cin)
                     w1_ref, b1_ref, w2_ref, b2_ref,      # conv1 / conv2 (packed)
                     w3_ref, b3_ref, w4_ref, b4_ref,      # conv3 / conv4 (packed)
                     wh1_ref, bh1_ref, wh2_ref, bh2_ref,  # task head linears
                     o_ref):                              # (1, 1, task_out)
    # ---- shared CNN1D feature extractor (all intermediates stay on-chip) ----
    x = x_ref[0].astype(jnp.float32)                      # (L, Cin)
    h = _conv_relu(x, w1_ref, b1_ref, 5)                  # (L, 32)
    h = _conv_relu(h, w2_ref, b2_ref, 3)                  # (L, 32)
    h = _maxpool2(h)                                      # (L/2, 32)
    h = _conv_relu(h, w3_ref, b3_ref, 3)                  # (L/2, 64)
    h = _maxpool2(h)                                      # (L/4, 64)
    h = _conv_relu(h, w4_ref, b4_ref, 3)                  # (L/4, 128)
    feat = jnp.mean(h, axis=0, keepdims=True)             # AdaptiveAvgPool1d(1) -> (1, 128)

    # dropout is identity at inference (eval mode)

    # ---- task head 0 (eval path of MultitaskModel): Linear -> ReLU -> Linear ----
    t = jnp.dot(feat.astype(jnp.bfloat16), wh1_ref[...],
                preferred_element_type=jnp.float32) + bh1_ref[...]
    t = jnp.maximum(t, 0.0)
    t = jnp.dot(t.astype(jnp.bfloat16), wh2_ref[...],
                preferred_element_type=jnp.float32) + bh2_ref[...]
    o_ref[...] = t.reshape(o_ref.shape).astype(o_ref.dtype)


# --------------------------------- wrapper -------------------------------------

def multitask_forward(params, x_ncl):
    """Inference forward of MultitaskModel (eval, use_idx=None -> task head 0).

    x_ncl: (B, C_in, L) PyTorch NCL layout  ->  (B, task_out)
    """
    B, cin, L = x_ncl.shape
    assert L % 4 == 0, "two MaxPool1d(2,2) stages require L divisible by 4"
    x = jnp.transpose(x_ncl, (0, 2, 1))                   # (B, L, Cin) channels-last

    def pack_conv(w, b):
        K, ci, co = w.shape
        assert K % 2 == 1, "'same' padding assumes odd kernel size"
        return (w.reshape(K * ci, co).astype(jnp.bfloat16),
                b.reshape(1, co).astype(jnp.float32))

    def pack_lin(w, b):
        ci, co = w.shape
        return w.astype(jnp.bfloat16), b.reshape(1, co).astype(jnp.float32)

    w1, b1 = pack_conv(*params["conv1"])
    w2, b2 = pack_conv(*params["conv2"])
    w3, b3 = pack_conv(*params["conv3"])
    w4, b4 = pack_conv(*params["conv4"])
    wh1, bh1 = pack_lin(*params["head_linear1"])
    wh2, bh2 = pack_lin(*params["head_linear2"])
    out_dim = wh2.shape[1]
    weights = (w1, b1, w2, b2, w3, b3, w4, b4, wh1, bh1, wh2, bh2)

    def full_spec(a):
        nd = a.ndim
        return pl.BlockSpec(a.shape, lambda b, _nd=nd: (0,) * _nd)   # resident weights

    grid_spec = pltpu.PrefetchScalarGridSpec(
        num_scalar_prefetch=0,
        grid=(B,),                                        # one program per batch element
        in_specs=[pl.BlockSpec((1, L, cin), lambda b: (b, 0, 0))]
                 + [full_spec(a) for a in weights],
        out_specs=pl.BlockSpec((1, 1, out_dim), lambda b: (b, 0, 0)),
    )
    # TODO(synk): for very long sequences, also tile L with a (K-1) halo per conv stage.

    out = pl.pallas_call(
        multitask_kernel,
        out_shape=jax.ShapeDtypeStruct((B, 1, out_dim), jnp.float32),
        grid_spec=grid_spec,
        compiler_params=pltpu.CompilerParams(
            dimension_semantics=("parallel",),            # shards batch across v7x's 2 TCs
            vmem_limit_bytes=32 * 1024 * 1024,            # safe on v7x (64 MiB) & v5e/v6e
        ),
    )(x, *weights)
    return out.reshape(B, out_dim)


# ------------------------------ parameter init ----------------------------------

def init_params(key, in_channels, feature_dim=128, task_dims=(64, 2), dtype=jnp.float32):
    """Synthetic parameters with PyTorch-default-like uniform scaling."""
    def conv(k, kern, ci, co):
        kw, kb = jax.random.split(k)
        bound = 1.0 / (ci * kern) ** 0.5
        return (jax.random.uniform(kw, (kern, ci, co), dtype, -bound, bound),
                jax.random.uniform(kb, (co,), dtype, -bound, bound))

    def linear(k, ci, co):
        kw, kb = jax.random.split(k)
        bound = 1.0 / ci ** 0.5
        return (jax.random.uniform(kw, (ci, co), dtype, -bound, bound),
                jax.random.uniform(kb, (co,), dtype, -bound, bound))

    k1, k2, k3, k4, k5, k6 = jax.random.split(key, 6)
    return {
        "conv1": conv(k1, 5, in_channels, 32),
        "conv2": conv(k2, 3, 32, 32),
        "conv3": conv(k3, 3, 32, 64),
        "conv4": conv(k4, 3, 64, feature_dim),
        "head_linear1": linear(k5, feature_dim, task_dims[0]),
        "head_linear2": linear(k6, task_dims[0], task_dims[1]),
    }


# ----------------------------------- main ----------------------------------------

if __name__ == "__main__":
    B, C_IN, L = 2, 4, 16
    FEATURE_DIM, TASK_DIMS = 128, (64, 2)

    key = jax.random.PRNGKey(0)
    k_param, k_x = jax.random.split(key)
    params = init_params(k_param, C_IN, FEATURE_DIM, TASK_DIMS)
    x = jax.random.normal(k_x, (B, C_IN, L), jnp.float32)   # PyTorch NCL input

    out = jax.jit(multitask_forward)(params, x)
    out = jax.block_until_ready(out)

    assert out.shape == (B, TASK_DIMS[1]), out.shape
    assert bool(jnp.all(jnp.isfinite(out)))
    print("KERNEL_OK")
</pallas_src>

<mosaic_0001>
module attributes {stable_mosaic.version = 11 : i64} {
  func.func @multitask_kernel(%arg0: i32, %arg1: memref<1x16x4xf32, #tpu.memory_space<vmem>>, %arg2: memref<20x32xbf16, #tpu.memory_space<vmem>>, %arg3: memref<1x32xf32, #tpu.memory_space<vmem>>, %arg4: memref<96x32xbf16, #tpu.memory_space<vmem>>, %arg5: memref<1x32xf32, #tpu.memory_space<vmem>>, %arg6: memref<96x64xbf16, #tpu.memory_space<vmem>>, %arg7: memref<1x64xf32, #tpu.memory_space<vmem>>, %arg8: memref<192x128xbf16, #tpu.memory_space<vmem>>, %arg9: memref<1x128xf32, #tpu.memory_space<vmem>>, %arg10: memref<128x64xbf16, #tpu.memory_space<vmem>>, %arg11: memref<1x64xf32, #tpu.memory_space<vmem>>, %arg12: memref<64x2xbf16, #tpu.memory_space<vmem>>, %arg13: memref<1x2xf32, #tpu.memory_space<vmem>>, %arg14: memref<1x1x2xf32, #tpu.memory_space<vmem>>) attributes {dimension_semantics = [#tpu.dimension_semantics<parallel>], iteration_bounds = array<i64: 2>, scalar_prefetch = 0 : i64, scratch_operands = 0 : i64, tpu.core_type = #tpu.core_type<tc>, window_params = [{transform_indices = @transform_0, window_bounds = array<i64: 1, 16, 4>}, {pipeline_mode = #tpu.pipeline_mode<synchronous>, transform_indices = @transform_1, window_bounds = array<i64: 20, 32>}, {pipeline_mode = #tpu.pipeline_mode<synchronous>, transform_indices = @transform_2, window_bounds = array<i64: 1, 32>}, {pipeline_mode = #tpu.pipeline_mode<synchronous>, transform_indices = @transform_3, window_bounds = array<i64: 96, 32>}, {pipeline_mode = #tpu.pipeline_mode<synchronous>, transform_indices = @transform_4, window_bounds = array<i64: 1, 32>}, {pipeline_mode = #tpu.pipeline_mode<synchronous>, transform_indices = @transform_5, window_bounds = array<i64: 96, 64>}, {pipeline_mode = #tpu.pipeline_mode<synchronous>, transform_indices = @transform_6, window_bounds = array<i64: 1, 64>}, {pipeline_mode = #tpu.pipeline_mode<synchronous>, transform_indices = @transform_7, window_bounds = array<i64: 192, 128>}, {pipeline_mode = #tpu.pipeline_mode<synchronous>, transform_indices = @transform_8, window_bounds = array<i64: 1, 128>}, {pipeline_mode = #tpu.pipeline_mode<synchronous>, transform_indices = @transform_9, window_bounds = array<i64: 128, 64>}, {pipeline_mode = #tpu.pipeline_mode<synchronous>, transform_indices = @transform_10, window_bounds = array<i64: 1, 64>}, {pipeline_mode = #tpu.pipeline_mode<synchronous>, transform_indices = @transform_11, window_bounds = array<i64: 64, 2>}, {pipeline_mode = #tpu.pipeline_mode<synchronous>, transform_indices = @transform_12, window_bounds = array<i64: 1, 2>}, {transform_indices = @transform_13, window_bounds = array<i64: 1, 1, 2>}]} {
    %c0 = arith.constant 0 : index
    %c0_0 = arith.constant 0 : index
    %c0_1 = arith.constant 0 : index
    %0 = vector.load %arg1[%c0, %c0_0, %c0_1] : memref<1x16x4xf32, #tpu.memory_space<vmem>>, vector<1x16x4xf32>
    %1 = vector.shape_cast %0 : vector<1x16x4xf32> to vector<16x4xf32>
    %cst = arith.constant 0.000000e+00 : f32
    %2 = vector.broadcast %cst : f32 to vector<2x4xf32>
    %3 = tpu.concatenate %2, %1, %2 in 0 : vector<2x4xf32>, vector<16x4xf32>, vector<2x4xf32> -> vector<20x4xf32>
    %4 = vector.extract_strided_slice %3 {offsets = [0, 0], sizes = [16, 4], strides = [1, 1]} : vector<20x4xf32> to vector<16x4xf32>
    %5 = vector.extract_strided_slice %3 {offsets = [1, 0], sizes = [16, 4], strides = [1, 1]} : vector<20x4xf32> to vector<16x4xf32>
    %6 = vector.extract_strided_slice %3 {offsets = [2, 0], sizes = [16, 4], strides = [1, 1]} : vector<20x4xf32> to vector<16x4xf32>
    %7 = vector.extract_strided_slice %3 {offsets = [3, 0], sizes = [16, 4], strides = [1, 1]} : vector<20x4xf32> to vector<16x4xf32>
    %8 = vector.extract_strided_slice %3 {offsets = [4, 0], sizes = [16, 4], strides = [1, 1]} : vector<20x4xf32> to vector<16x4xf32>
    %9 = tpu.concatenate %4, %5, %6, %7, %8 in 1 : vector<16x4xf32>, vector<16x4xf32>, vector<16x4xf32>, vector<16x4xf32>, vector<16x4xf32> -> vector<16x20xf32>
    %10 = arith.truncf %9 : vector<16x20xf32> to vector<16x20xbf16>
    %c0_2 = arith.constant 0 : index
    %c0_3 = arith.constant 0 : index
    %11 = vector.load %arg2[%c0_2, %c0_3] : memref<20x32xbf16, #tpu.memory_space<vmem>>, vector<20x32xbf16>
    %cst_4 = arith.constant dense<0.000000e+00> : vector<16x32xf32>
    %12 = tpu.matmul %10, %11, %cst_4 {dimension_numbers = #tpu.dot_dimension_numbers<[1], [0], [0], [1], [0, 0, 1, 1], [], []>} : vector<16x20xbf16>, vector<20x32xbf16>, vector<16x32xf32> -> vector<16x32xf32>
    %c0_5 = arith.constant 0 : index
    %c0_6 = arith.constant 0 : index
    %13 = vector.load %arg3[%c0_5, %c0_6] : memref<1x32xf32, #tpu.memory_space<vmem>>, vector<1x32xf32>
    %14 = vector.broadcast %13 : vector<1x32xf32> to vector<16x32xf32>
    %15 = arith.addf %12, %14 : vector<16x32xf32>
    %cst_7 = arith.constant 0.000000e+00 : f32
    %16 = vector.broadcast %cst_7 : f32 to vector<16x32xf32>
    %17 = arith.maximumf %15, %16 : vector<16x32xf32>
    %cst_8 = arith.constant 0.000000e+00 : f32
    %18 = vector.broadcast %cst_8 : f32 to vector<1x32xf32>
    %19 = tpu.concatenate %18, %17, %18 in 0 : vector<1x32xf32>, vector<16x32xf32>, vector<1x32xf32> -> vector<18x32xf32>
    %20 = vector.extract_strided_slice %19 {offsets = [0, 0], sizes = [16, 32], strides = [1, 1]} : vector<18x32xf32> to vector<16x32xf32>
    %21 = vector.extract_strided_slice %19 {offsets = [1, 0], sizes = [16, 32], strides = [1, 1]} : vector<18x32xf32> to vector<16x32xf32>
    %22 = vector.extract_strided_slice %19 {offsets = [2, 0], sizes = [16, 32], strides = [1, 1]} : vector<18x32xf32> to vector<16x32xf32>
    %23 = tpu.concatenate %20, %21, %22 in 1 : vector<16x32xf32>, vector<16x32xf32>, vector<16x32xf32> -> vector<16x96xf32>
    %24 = arith.truncf %23 : vector<16x96xf32> to vector<16x96xbf16>
    %c0_9 = arith.constant 0 : index
    %c0_10 = arith.constant 0 : index
    %25 = vector.load %arg4[%c0_9, %c0_10] : memref<96x32xbf16, #tpu.memory_space<vmem>>, vector<96x32xbf16>
    %cst_11 = arith.constant dense<0.000000e+00> : vector<16x32xf32>
    %26 = tpu.matmul %24, %25, %cst_11 {dimension_numbers = #tpu.dot_dimension_numbers<[1], [0], [0], [1], [0, 0, 1, 1], [], []>} : vector<16x96xbf16>, vector<96x32xbf16>, vector<16x32xf32> -> vector<16x32xf32>
    %c0_12 = arith.constant 0 : index
    %c0_13 = arith.constant 0 : index
    %27 = vector.load %arg5[%c0_12, %c0_13] : memref<1x32xf32, #tpu.memory_space<vmem>>, vector<1x32xf32>
    %28 = vector.broadcast %27 : vector<1x32xf32> to vector<16x32xf32>
    %29 = arith.addf %26, %28 : vector<16x32xf32>
    %cst_14 = arith.constant 0.000000e+00 : f32
    %30 = vector.broadcast %cst_14 : f32 to vector<16x32xf32>
    %31 = arith.maximumf %29, %30 : vector<16x32xf32>
    %32 = vector.shape_cast %31 : vector<16x32xf32> to vector<8x2x32xf32>
    %cst_15 = arith.constant dense<0xFF800000> : vector<8x32xf32>
    %33 = vector.multi_reduction <maximumf>, %32, %cst_15 [1] : vector<8x2x32xf32> to vector<8x32xf32>
    %cst_16 = arith.constant 0.000000e+00 : f32
    %34 = vector.broadcast %cst_16 : f32 to vector<1x32xf32>
    %35 = tpu.concatenate %34, %33, %34 in 0 : vector<1x32xf32>, vector<8x32xf32>, vector<1x32xf32> -> vector<10x32xf32>
    %36 = vector.extract_strided_slice %35 {offsets = [0, 0], sizes = [8, 32], strides = [1, 1]} : vector<10x32xf32> to vector<8x32xf32>
    %37 = vector.extract_strided_slice %35 {offsets = [1, 0], sizes = [8, 32], strides = [1, 1]} : vector<10x32xf32> to vector<8x32xf32>
    %38 = vector.extract_strided_slice %35 {offsets = [2, 0], sizes = [8, 32], strides = [1, 1]} : vector<10x32xf32> to vector<8x32xf32>
    %39 = tpu.concatenate %36, %37, %38 in 1 : vector<8x32xf32>, vector<8x32xf32>, vector<8x32xf32> -> vector<8x96xf32>
    %40 = arith.truncf %39 : vector<8x96xf32> to vector<8x96xbf16>
    %c0_17 = arith.constant 0 : index
    %c0_18 = arith.constant 0 : index
    %41 = vector.load %arg6[%c0_17, %c0_18] : memref<96x64xbf16, #tpu.memory_space<vmem>>, vector<96x64xbf16>
    %cst_19 = arith.constant dense<0.000000e+00> : vector<8x64xf32>
    %42 = tpu.matmul %40, %41, %cst_19 {dimension_numbers = #tpu.dot_dimension_numbers<[1], [0], [0], [1], [0, 0, 1, 1], [], []>} : vector<8x96xbf16>, vector<96x64xbf16>, vector<8x64xf32> -> vector<8x64xf32>
    %c0_20 = arith.constant 0 : index
    %c0_21 = arith.constant 0 : index
    %43 = vector.load %arg7[%c0_20, %c0_21] : memref<1x64xf32, #tpu.memory_space<vmem>>, vector<1x64xf32>
    %44 = vector.broadcast %43 : vector<1x64xf32> to vector<8x64xf32>
    %45 = arith.addf %42, %44 : vector<8x64xf32>
    %cst_22 = arith.constant 0.000000e+00 : f32
    %46 = vector.broadcast %cst_22 : f32 to vector<8x64xf32>
    %47 = arith.maximumf %45, %46 : vector<8x64xf32>
    %48 = vector.shape_cast %47 : vector<8x64xf32> to vector<4x2x64xf32>
    %cst_23 = arith.constant dense<0xFF800000> : vector<4x64xf32>
    %49 = vector.multi_reduction <maximumf>, %48, %cst_23 [1] : vector<4x2x64xf32> to vector<4x64xf32>
    %cst_24 = arith.constant 0.000000e+00 : f32
    %50 = vector.broadcast %cst_24 : f32 to vector<1x64xf32>
    %51 = tpu.concatenate %50, %49, %50 in 0 : vector<1x64xf32>, vector<4x64xf32>, vector<1x64xf32> -> vector<6x64xf32>
    %52 = vector.extract_strided_slice %51 {offsets = [0, 0], sizes = [4, 64], strides = [1, 1]} : vector<6x64xf32> to vector<4x64xf32>
    %53 = vector.extract_strided_slice %51 {offsets = [1, 0], sizes = [4, 64], strides = [1, 1]} : vector<6x64xf32> to vector<4x64xf32>
    %54 = vector.extract_strided_slice %51 {offsets = [2, 0], sizes = [4, 64], strides = [1, 1]} : vector<6x64xf32> to vector<4x64xf32>
    %55 = tpu.concatenate %52, %53, %54 in 1 : vector<4x64xf32>, vector<4x64xf32>, vector<4x64xf32> -> vector<4x192xf32>
    %56 = arith.truncf %55 : vector<4x192xf32> to vector<4x192xbf16>
    %c0_25 = arith.constant 0 : index
    %c0_26 = arith.constant 0 : index
    %57 = vector.load %arg8[%c0_25, %c0_26] : memref<192x128xbf16, #tpu.memory_space<vmem>>, vector<192x128xbf16>
    %cst_27 = arith.constant dense<0.000000e+00> : vector<4x128xf32>
    %58 = tpu.matmul %56, %57, %cst_27 {dimension_numbers = #tpu.dot_dimension_numbers<[1], [0], [0], [1], [0, 0, 1, 1], [], []>} : vector<4x192xbf16>, vector<192x128xbf16>, vector<4x128xf32> -> vector<4x128xf32>
    %c0_28 = arith.constant 0 : index
    %c0_29 = arith.constant 0 : index
    %59 = vector.load %arg9[%c0_28, %c0_29] : memref<1x128xf32, #tpu.memory_space<vmem>>, vector<1x128xf32>
    %60 = vector.broadcast %59 : vector<1x128xf32> to vector<4x128xf32>
    %61 = arith.addf %58, %60 : vector<4x128xf32>
    %cst_30 = arith.constant 0.000000e+00 : f32
    %62 = vector.broadcast %cst_30 : f32 to vector<4x128xf32>
    %63 = arith.maximumf %61, %62 : vector<4x128xf32>
    %cst_31 = arith.constant dense<0.000000e+00> : vector<128xf32>
    %64 = vector.multi_reduction <add>, %63, %cst_31 [0] : vector<4x128xf32> to vector<128xf32>
    %65 = vector.shape_cast %64 : vector<128xf32> to vector<1x128xf32>
    %cst_32 = arith.constant 4.000000e+00 : f32
    %66 = vector.broadcast %cst_32 : f32 to vector<1x128xf32>
    %67 = arith.divf %65, %66 : vector<1x128xf32>
    %68 = arith.truncf %67 : vector<1x128xf32> to vector<1x128xbf16>
    %c0_33 = arith.constant 0 : index
    %c0_34 = arith.constant 0 : index
    %69 = vector.load %arg10[%c0_33, %c0_34] : memref<128x64xbf16, #tpu.memory_space<vmem>>, vector<128x64xbf16>
    %cst_35 = arith.constant dense<0.000000e+00> : vector<1x64xf32>
    %70 = tpu.matmul %68, %69, %cst_35 {dimension_numbers = #tpu.dot_dimension_numbers<[1], [0], [0], [1], [0, 0, 1, 1], [], []>} : vector<1x128xbf16>, vector<128x64xbf16>, vector<1x64xf32> -> vector<1x64xf32>
    %c0_36 = arith.constant 0 : index
    %c0_37 = arith.constant 0 : index
    %71 = vector.load %arg11[%c0_36, %c0_37] : memref<1x64xf32, #tpu.memory_space<vmem>>, vector<1x64xf32>
    %72 = arith.addf %70, %71 : vector<1x64xf32>
    %cst_38 = arith.constant 0.000000e+00 : f32
    %73 = vector.broadcast %cst_38 : f32 to vector<1x64xf32>
    %74 = arith.maximumf %72, %73 : vector<1x64xf32>
    %75 = arith.truncf %74 : vector<1x64xf32> to vector<1x64xbf16>
    %c0_39 = arith.constant 0 : index
    %c0_40 = arith.constant 0 : index
    %76 = vector.load %arg12[%c0_39, %c0_40] : memref<64x2xbf16, #tpu.memory_space<vmem>>, vector<64x2xbf16>
    %cst_41 = arith.constant dense<0.000000e+00> : vector<1x2xf32>
    %77 = tpu.matmul %75, %76, %cst_41 {dimension_numbers = #tpu.dot_dimension_numbers<[1], [0], [0], [1], [0, 0, 1, 1], [], []>} : vector<1x64xbf16>, vector<64x2xbf16>, vector<1x2xf32> -> vector<1x2xf32>
    %c0_42 = arith.constant 0 : index
    %c0_43 = arith.constant 0 : index
    %78 = vector.load %arg13[%c0_42, %c0_43] : memref<1x2xf32, #tpu.memory_space<vmem>>, vector<1x2xf32>
    %79 = arith.addf %77, %78 : vector<1x2xf32>
    %80 = vector.shape_cast %79 : vector<1x2xf32> to vector<1x1x2xf32>
    %c0_44 = arith.constant 0 : index
    %c0_45 = arith.constant 0 : index
    %c0_46 = arith.constant 0 : index
    %81 = vector.load %arg14[%c0_44, %c0_45, %c0_46] : memref<1x1x2xf32, #tpu.memory_space<vmem>>, vector<1x1x2xf32>
    tpu.vector_store %arg14[%c0_44, %c0_45, %c0_46], %80 {strides = array<i32>} : memref<1x1x2xf32, #tpu.memory_space<vmem>>, vector<1x1x2xf32>,
    return
  }
  func.func @transform_0(%arg0: i32) -> (i32, i32, i32) {
    %c0_i32 = arith.constant 0 : i32
    %c0_i32_0 = arith.constant 0 : i32
    %c0_i32_1 = arith.constant 0 : i32
    return %arg0, %c0_i32, %c0_i32_0 : i32, i32, i32
  }
  func.func @transform_1(%arg0: i32) -> (i32, i32) {
    %c0_i32 = arith.constant 0 : i32
    %c0_i32_0 = arith.constant 0 : i32
    %c0_i32_1 = arith.constant 0 : i32
    return %c0_i32, %c0_i32_0 : i32, i32
  }
  func.func @transform_2(%arg0: i32) -> (i32, i32) {
    %c0_i32 = arith.constant 0 : i32
    %c0_i32_0 = arith.constant 0 : i32
    %c0_i32_1 = arith.constant 0 : i32
    return %c0_i32, %c0_i32_0 : i32, i32
  }
  func.func @transform_3(%arg0: i32) -> (i32, i32) {
    %c0_i32 = arith.constant 0 : i32
    %c0_i32_0 = arith.constant 0 : i32
    %c0_i32_1 = arith.constant 0 : i32
    return %c0_i32, %c0_i32_0 : i32, i32
  }
  func.func @transform_4(%arg0: i32) -> (i32, i32) {
    %c0_i32 = arith.constant 0 : i32
    %c0_i32_0 = arith.constant 0 : i32
    %c0_i32_1 = arith.constant 0 : i32
    return %c0_i32, %c0_i32_0 : i32, i32
  }
  func.func @transform_5(%arg0: i32) -> (i32, i32) {
    %c0_i32 = arith.constant 0 : i32
    %c0_i32_0 = arith.constant 0 : i32
    %c0_i32_1 = arith.constant 0 : i32
    return %c0_i32, %c0_i32_0 : i32, i32
  }
  func.func @transform_6(%arg0: i32) -> (i32, i32) {
    %c0_i32 = arith.constant 0 : i32
    %c0_i32_0 = arith.constant 0 : i32
    %c0_i32_1 = arith.constant 0 : i32
    return %c0_i32, %c0_i32_0 : i32, i32
  }
  func.func @transform_7(%arg0: i32) -> (i32, i32) {
    %c0_i32 = arith.constant 0 : i32
    %c0_i32_0 = arith.constant 0 : i32
    %c0_i32_1 = arith.constant 0 : i32
    return %c0_i32, %c0_i32_0 : i32, i32
  }
  func.func @transform_8(%arg0: i32) -> (i32, i32) {
    %c0_i32 = arith.constant 0 : i32
    %c0_i32_0 = arith.constant 0 : i32
    %c0_i32_1 = arith.constant 0 : i32
    return %c0_i32, %c0_i32_0 : i32, i32
  }
  func.func @transform_9(%arg0: i32) -> (i32, i32) {
    %c0_i32 = arith.constant 0 : i32
    %c0_i32_0 = arith.constant 0 : i32
    %c0_i32_1 = arith.constant 0 : i32
    return %c0_i32, %c0_i32_0 : i32, i32
  }
  func.func @transform_10(%arg0: i32) -> (i32, i32) {
    %c0_i32 = arith.constant 0 : i32
    %c0_i32_0 = arith.constant 0 : i32
    %c0_i32_1 = arith.constant 0 : i32
    return %c0_i32, %c0_i32_0 : i32, i32
  }
  func.func @transform_11(%arg0: i32) -> (i32, i32) {
    %c0_i32 = arith.constant 0 : i32
    %c0_i32_0 = arith.constant 0 : i32
    %c0_i32_1 = arith.constant 0 : i32
    return %c0_i32, %c0_i32_0 : i32, i32
  }
  func.func @transform_12(%arg0: i32) -> (i32, i32) {
    %c0_i32 = arith.constant 0 : i32
    %c0_i32_0 = arith.constant 0 : i32
    %c0_i32_1 = arith.constant 0 : i32
    return %c0_i32, %c0_i32_0 : i32, i32
  }
  func.func @transform_13(%arg0: i32) -> (i32, i32, i32) {
    %c0_i32 = arith.constant 0 : i32
    %c0_i32_0 = arith.constant 0 : i32
    %c0_i32_1 = arith.constant 0 : i32
    return %arg0, %c0_i32, %c0_i32_0 : i32, i32, i32
  }
}

</mosaic_0001>

<bundles_post_ra>
// kernel: multitask_forward.1
= control target key start
LH: loop header
LB: loop body
LE: loop exit
PB: predicated region body
PF: predicated region fallthrough
CT: control target
= control target key end

     0   :  { %s2201_s0 = inlined_call_operand.vmem [shape: f32[2,16,4], index: 0, kind: input, shape index: {}]   ;;  %s2202_s1 = inlined_call_operand.vmem [shape: bf16[20,32], index: 1, kind: input, shape index: {}]   ;;  %s2203_s2 = inlined_call_operand.vmem [shape: f32[1,32], index: 2, kind: input, shape index: {}]   ;;  %s2204_s3 = inlined_call_operand.vmem [shape: bf16[96,32], index: 3, kind: input, shape index: {}]   ;;  %s2205_s4 = inlined_call_operand.vmem [shape: f32[1,32], index: 4, kind: input, shape index: {}]   ;;  %s2206_s5 = inlined_call_operand.vmem [shape: bf16[96,64], index: 5, kind: input, shape index: {}]   ;;  %s2207_s6 = inlined_call_operand.vmem [shape: f32[1,64], index: 6, kind: input, shape index: {}]   ;;  %s2208_s7 = inlined_call_operand.vmem [shape: bf16[192,128], index: 7, kind: input, shape index: {}]   ;;  %s2209_s8 = inlined_call_operand.vmem [shape: f32[1,128], index: 8, kind: input, shape index: {}]   ;;  %s2210_s9 = inlined_call_operand.vmem [shape: bf16[128,64], index: 9, kind: input, shape index: {}]   ;;  %s2211_s10 = inlined_call_operand.vmem [shape: f32[1,64], index: 10, kind: input, shape index: {}]   ;;  %s2212_s11 = inlined_call_operand.vmem [shape: bf16[64,2], index: 11, kind: input, shape index: {}]   ;;  %s2213_s12 = inlined_call_operand.vmem [shape: f32[1,2], index: 12, kind: input, shape index: {}]   ;;  %s2214_s13 = inlined_call_operand.hbm [shape: f32[2,1,2], index: 13, kind: output, shape index: {}]  }
   0x1   :  { %2218 = sst [smem:[#allocation5_spill]] %s2201_s0 }
   0x2   :  { %2219 = sst [smem:[#allocation6_spill]] %s2202_s1 }
   0x3   :  { %2220 = sst [smem:[#allocation7_spill]] %s2203_s2 }
   0x4   :  { %18 = vsyncpa [#allocation3], 0 }
   0x5   :  { %20 = vsyncpa [#allocation3 + $0x1], 0  ;;  %s1870_s25 = smov 0   ;;  %s1872_s26 = smov 0  }
   0x6   :  { %s1874_s27 = smov 0   ;;  %s1876_s28 = smov 0  }
   0x7 LB: > { %s1891_s29 = sadd.s32 4294967295, %s1787_s28   ;;  %s1450_s30 = sadd.s32 4294967294, %s1787_s28   ;;  %s1787_s28 = sphi %s1876_s28, %s2231_s28   ;;  %s1783_s27 = sphi %s1874_s27, %s2230_s27   ;;  %s1779_s26 = sphi %s1872_s26, %s2229_s26   ;;  %s1775_s25 = sphi %s1870_s25, %s2228_s25  }
   0x8   : > { %s1895_s14 = sadd.s32 1, %s1787_s28   ;;  %s311_s15 = sadd.s32 1, %s1783_s27 }
   0x9   : > { %s308_s16 = ssub.s32 %s1787_s28, %s1895_s14  ;;  %p321_p0 = scmp.ne.s32.totalorder %s1783_s27, %s1779_s26 }
   0xa   : > { %p309_p1 = scmp.eq.s32.totalorder %s308_s16, 0  ;;  %p322_p2 = scmp.eq.s32.totalorder %s1891_s29, 1 }
   0xb   : > { %p327_p3 = scmp.ne.s32.totalorder %s1779_s26, %s1775_s25  ;;  %p328_p4 = scmp.eq.s32.totalorder %s1450_s30, 1 }
   0xc   : > { %s1906_s17 = scalar_select %p309_p1, %s1783_s27, %s311_s15  }
   0xd   : > { %p1908_p5 = por %p322_p2, %p321_p0  ;;  %p1912_p6 = por %p328_p4, %p327_p3 }
   0xe   : > { %p1453_p7 = scmp.ge.s32.totalorder %s1787_s28, 1  ;;  %p390_p8 = scmp.lt.s32.totalorder %s1787_s28, 3 }
  0x10   : > { %p391_p9 = pnand %p1453_p7, %p390_p8 }
  0x11   : > { %p433_p10 = scmp.lt.s32.totalorder (!%p391_p9), %s1891_s29, 1  ;;  %s2223_s1 = sld [smem:[#allocation6_spill]] (!%p391_p9) }
  0x12   : > { %394 = sbr.rel (%p391_p9) target bundleno = 1799 (0x707), region = 72  ;;  %s2224_s0 = sld [smem:[#allocation5_spill]] (!%p391_p9) }
  0x13   : > { %s1790_s21 = smov (!%p391_p9), 4   ;;  %s1791_s22 = smov (!%p391_p9), 12  }
  0x14   : > { %s1794_s24 = smov (!%p391_p9), 16   ;;  %s2225_s2 = sld [smem:[#allocation7_spill]] (!%p391_p9) }
  0x17   : > { %s434_s20 = scalar_select %p433_p10, %s1891_s29, 1  ;;  %v1689_v0 = vld [vmem:[%s2223_s1 + $0x8] ss:$0 sps:$4 sm:$0x33]   ;;  %vm443_vm0 = vcmask 1041408   ;;  %v1789_v1 = vmov 0.0  }
  0x18   : > { %1538 = vmatprep.subr.bf16.mxu0 %v1789_v1  ;;  %v539_v2 = vsel %vm443_vm0, %v1689_v0, 0  ;;  %1546 = vmatprep.subr.bf16.mxu1 %v1789_v1  ;;  %vm454_vm1 = vcmask 1046528   ;;  %vm478_vm2 = vcmask 1044480   ;;  %vm466_vm3 = vcmask 1045504   ;;  %v1690_v7 = vld [vmem:[%s2223_s1] sm:$0xff]   ;;  %v1691_v56 = vld [vmem:[%s2204_s3 + $0x28] sm:$0xff]  }
  0x19   : > { %s1506_s23 = sshll.u32 %s434_s20, 4  ;;  %1539 = vmatpush3.bf16.msra.mxu0 %v539_v2  ;;  %vm490_vm4 = vcmask 1043456   ;;  %vm1792_vm5 = vmmov 0   ;;  %vm502_vm6 = vcmask 31744   ;;  %vm505_vm7 = vcmask 64512   ;;  %1547 = vmatpush3.bf16.msra.mxu1 %v1691_v56  ;;  %v1692_v57 = vld [vmem:[%s2204_s3 + $0x20] sm:$0xff]  }
  0x1a   : > { %s437_s15 = scalar_lea.vmem %s2224_s0, %s1506_s23  ;;  %1540 = vmatprep.subr.bf16.mxu0 %v1789_v1  ;;  %1542 = vmatprep.mubr.msk.bf16.mxu0 %vm1792_vm5, %v1789_v1  ;;  %s1793_s23 = smov 8   ;;  %vm508_vm8 = vcmask 97280   ;;  %vm511_vm9 = vcmask 130048   ;;  %vm534_vm10 = vcmask 162816   ;;  %v1693_v58 = vld [vmem:[%s2204_s3 + $0x18] sm:$0xff]   ;;  %v1694_v59 = vld [vmem:[%s2204_s3 + $0x10] sm:$0xff]  }
  0x1b   : > { %v439_v3 = vld [vmem:[%s437_s15] sm:$0xff]  ;;  %v440_v4 = vld [vmem:[%s437_s15 + $0x8] sm:$0xff]  ;;  %1558 = vmatprep.mubr.msk.bf16.mxu1 %vm1792_vm5, %v1789_v1  ;;  %1548 = vmatprep.subr.bf16.mxu1 %v1789_v1  ;;  %vm586_vm11 = vcmask 1040384   ;;  %vm619_vm12 = vcmask 261120   ;;  %vm622_vm13 = vcmask 523264   ;;  %vm681_vm14 = vcmask 785408  }
  0x1c   : > { %v444_v5 = vrot.slane %v439_v3, 6  ;;  %v445_v6 = vrot.slane %v440_v4, 6  ;;  %v1695_v60 = vld [vmem:[%s2204_s3 + $0x8] sm:$0xff]   ;;  %v1456_v61 = vld [vmem:[%s2225_s2] ss:$0 sm:$0xff]  ;;  %vm772_vm15 = vcmask 254976  }
  0x1d   : > { %1541 = vmatpush3.bf16.msra.mxu0 %v1690_v7  ;;  %1549 = vmatpush3.bf16.msra.mxu1 %v1692_v57  ;;  %s1503_s0 = sshll.u32 %s1891_s29, 4  ;;  %s1799_s20 = smov [#allocation2]  }
  0x1e   : > { %v446_v8 = vsel %vm443_vm0, %v444_v5, %v445_v6  ;;  %v450_v9 = vsel %vm443_vm0, 0.0, %v444_v5  ;;  %v451_v10 = vsel %vm443_vm0, %v445_v6, 0.0  ;;  %1562 = vmatprep.subr.bf16.mxu0 %v1789_v1  ;;  %1550 = vmatprep.subr.bf16.mxu1 %v1789_v1  ;;  %v1696_v6 = vld [vmem:[%s2204_s3] sm:$0xff]   ;;  %vm837_vm0 = vcmask 1042434   ;;  %s1731_s1 = sshll.u32 %s1799_s20, 4  ;;  %s1732_s1 = int_to_ptr.vmem [resolvable:$false] %s1731_s1 }
  0x1f   : > { %v455_v11 = vrot.slane %v450_v9, 1  ;;  %v456_v12 = vrot.slane %v446_v8, 1  ;;  %v458_v13 = vrot.slane %v451_v10, 1  ;;  %v479_v14 = vrot.slane %v450_v9, 3  ;;  %s1733_s15 = scalar_lea.vmem %s1732_s1, 32 }
  0x20   : > { %v480_v15 = vrot.slane %v446_v8, 3  ;;  %v482_v16 = vrot.slane %v451_v10, 3  ;;  %v467_v17 = vrot.slane %v450_v9, 2  ;;  %v468_v18 = vrot.slane %v446_v8, 2 }
  0x21   : > { %v457_v19 = vsel %vm454_vm1, %v455_v11, %v456_v12  ;;  %v459_v20 = vsel %vm454_vm1, %v456_v12, %v458_v13  ;;  %v470_v21 = vrot.slane %v451_v10, 2  ;;  %v491_v22 = vrot.slane %v450_v9, 4  ;;  %1551 = vmatpush3.bf16.msra.mxu1 %v1693_v58 }
  0x22   : > { %v1659_v23 = vpack.i.bf16 %v459_v20, %v457_v19  ;;  %v481_v24 = vsel %vm478_vm2, %v479_v14, %v480_v15  ;;  %v483_v25 = vsel %vm478_vm2, %v480_v15, %v482_v16  ;;  %v469_v26 = vsel %vm466_vm3, %v467_v17, %v468_v18  ;;  %1552 = vmatprep.subr.bf16.mxu1 %v1789_v1 }
  0x23   : > { %v1669_v27 = vpack.i.bf16 %v483_v25, %v481_v24  ;;  %v471_v28 = vsel %vm466_vm3, %v468_v18, %v470_v21  ;;  %v492_v29 = vrot.slane %v446_v8, 4  ;;  %v494_v30 = vrot.slane %v451_v10, 4 }
  0x24   : > { %1660 = vrot.lane.b32.xlu0 %v1659_v23, %s1790_s21  ;;  %v1664_v31 = vpack.i.bf16 %v471_v28, %v469_v26  ;;  %s2226_s21 = smov 64  }
  0x25   : > { %1670 = vrot.lane.b32.xlu1 %v1669_v27, %s1791_s22  ;;  %v493_v32 = vsel %vm490_vm4, %v491_v22, %v492_v29  ;;  %v495_v33 = vsel %vm490_vm4, %v492_v29, %v494_v30  ;;  %1553 = vmatpush3.bf16.msra.mxu1 %v1694_v59  ;;  %s2227_s22 = smov 32  }
  0x26   : > { %v1674_v34 = vpack.i.bf16 %v495_v33, %v493_v32  ;;  %1554 = vmatprep.subr.bf16.mxu1 %v1789_v1 }
  0x28   : > { %1665 = vrot.lane.b32.xlu0 %v1664_v31, %s1793_s23  ;;  %s2216_s23 = smov 64  }
  0x29   : > { %1675 = vrot.lane.b32.xlu1 %v1674_v34, %s1794_s24  ;;  %1555 = vmatpush3.bf16.msra.mxu1 %v1695_v60  ;;  %s2215_s24 = smov 32  }
  0x2a   : > { %1556 = vmatprep.subr.bf16.mxu1 %v1789_v1 }
  0x2d   : > { %1557 = vmatpush3.bf16.msra.mxu1 %v1696_v6 }
  0x96   : > { %v1661_v35 = vpop.permute.xlu0 %1660 }
  0x97   : > { %v1671_v36 = vpop.permute.xlu1 %1670  ;;  %v1663_v37 = vunpack.i.h.bf16 %v1661_v35  ;;  %v1662_v38 = vunpack.i.l.bf16 %v1661_v35 }
  0x98   : > { %v1673_v40 = vunpack.i.h.bf16 %v1671_v36  ;;  %v1672_v41 = vunpack.i.l.bf16 %v1671_v36  ;;  %v1697_v36 = vld [vmem:[%s2206_s5 + $0x28] sm:$0xff]  }
  0x99   : > { %v504_v45 = vsel %vm502_vm6, %v446_v8, %v1663_v37  ;;  %v503_v46 = vsel %vm502_vm6, %v450_v9, %v1662_v38  ;;  %v1698_v37 = vld [vmem:[%s2206_s5 + $0x20] sm:$0xff]   ;;  %v1699_v38 = vld [vmem:[%s2206_s5 + $0x18] sm:$0xff]   ;;  %vm839_vm6 = vcmask 1043459  }
  0x9a   : > { %v1666_v39 = vpop.permute.xlu0 %1665 }
  0x9b   : > { %v1668_v42 = vunpack.i.h.bf16 %v1666_v39  ;;  %v1667_v43 = vunpack.i.l.bf16 %v1666_v39  ;;  %v1676_v44 = vpop.permute.xlu1 %1675  ;;  %v1700_v39 = vld [vmem:[%s2206_s5 + $0x10] sm:$0xff]  }
  0x9c   : > { %v1678_v47 = vunpack.i.h.bf16 %v1676_v44  ;;  %v1677_v48 = vunpack.i.l.bf16 %v1676_v44 }
  0x9d   : > { %v506_v49 = vsel %vm505_vm7, %v503_v46, %v1667_v43  ;;  %v507_v50 = vsel %vm505_vm7, %v504_v45, %v1668_v42  ;;  %v734_v43 = vlaneseq  ;;  %v1460_v46 = vld [vmem:[%s2205_s4] ss:$0 sm:$0xff]  ;;  %vm841_vm7 = vcmask 1044484  }
  0x9e   : > { %v509_v51 = vsel %vm508_vm8, %v506_v49, %v1672_v41  ;;  %v510_v52 = vsel %vm508_vm8, %v507_v50, %v1673_v40  ;;  %v1701_v40 = vld [vmem:[%s2206_s5 + $0x8] sm:$0xff]   ;;  %v1797_v41 = vmov 1983009808   ;;  %vm843_vm8 = vcmask 1045509  }
  0x9f   : > { %v512_v53 = vsel %vm511_vm9, %v509_v51, %v1677_v48  ;;  %v513_v54 = vsel %vm511_vm9, %v510_v52, %v1678_v47  ;;  %v732_v42 = vunpack.c.l.s4 %v1797_v41  ;;  %v735_v45 = vshrl.u32 %v734_v43, 7 }
  0xa0   : > { %v514_v55 = vpack.c.bf16 %v513_v54, %v512_v53  ;;  %vm845_vm9 = vcmask 1046534  }
  0xa1   : > { %v733_v44 = vunpack.c.0.s8 %v732_v42 }
  0xa2   : > { %1543 = vmatmul.mubr.msk.bf16.vlgmr.msra.gmra.mxu0 %vm534_vm10, %v514_v55  ;;  %vm847_vm10 = vcmask 1047559  }
  0xa3   : > { %1574 = vmatprep.mubr.msk.bf16.mxu0 %vm1792_vm5, %v1789_v1  ;;  %1563 = vmatpush3.bf16.msra.mxu0 %v1697_v36  ;;  %v2014_v49 = vsub.s32 %v733_v44, %v735_v45 }
  0xa4   : > { %1564 = vmatprep.subr.bf16.mxu0 %v1789_v1 }
  0xa7   : > { %1565 = vmatpush3.bf16.msra.mxu0 %v1698_v37 }
  0xa8   : > { %1566 = vmatprep.subr.bf16.mxu0 %v1789_v1 }
  0xab   : > { %1567 = vmatpush3.bf16.msra.mxu0 %v1699_v38 }
  0xac   : > { %1568 = vmatprep.subr.bf16.mxu0 %v1789_v1 }
  0xaf   : > { %1569 = vmatpush3.bf16.msra.mxu0 %v1700_v39 }
  0xb0   : > { %1570 = vmatprep.subr.bf16.mxu0 %v1789_v1 }
  0xb3   : > { %1571 = vmatpush3.bf16.msra.mxu0 %v1701_v40 }
  0xb4   : > { %1572 = vmatprep.subr.bf16.mxu0 %v1789_v1 }
 0x162   : > { %v575_v62 = vpop.f32.mrf.mxu0 }
 0x163   : > { %v576_v63 = vadd.f32 %v1456_v61, %v575_v62 }
 0x164   : > { %v1544_v0 = vpop.f32.mrf.mxu0 }
 0x165   : > { %v582_v2 = vmax.f32 %v576_v63, 0.0 }
 0x166   : > { %v578_v3 = vpop.f32.mrf.mxu0 }
 0x167   : > { %v587_v4 = vrot.slane %v582_v2, 7  ;;  %v579_v5 = vadd.f32 %v1456_v61, %v578_v3 }
 0x168   : > { %v1545_v7 = vpop.f32.mrf.mxu0 }
 0x169   : > { %v583_v8 = vmax.f32 %v579_v5, 0.0  ;;  %v593_v9 = vsel %vm586_vm11, 0.0, %v587_v4 }
 0x16a   : > { %v597_v11 = vrot.slane %v593_v9, 1  ;;  %v608_v12 = vrot.slane %v593_v9, 2 }
 0x16b   : > { %v588_v10 = vrot.slane %v583_v8, 7 }
 0x16d   : > { %v589_v13 = vsel %vm586_vm11, %v587_v4, %v588_v10  ;;  %v594_v14 = vsel %vm586_vm11, %v588_v10, 0.0 }
 0x16e   : > { %v598_v15 = vrot.slane %v589_v13, 1  ;;  %v600_v16 = vrot.slane %v594_v14, 1  ;;  %v609_v17 = vrot.slane %v589_v13, 2  ;;  %v611_v18 = vrot.slane %v594_v14, 2 }
 0x170   : > { %v610_v19 = vsel %vm466_vm3, %v608_v12, %v609_v17  ;;  %v612_v20 = vsel %vm466_vm3, %v609_v17, %v611_v18  ;;  %v599_v21 = vsel %vm454_vm1, %v597_v11, %v598_v15  ;;  %v601_v22 = vsel %vm454_vm1, %v598_v15, %v600_v16 }
 0x171   : > { %v1684_v23 = vpack.i.bf16 %v612_v20, %v610_v19  ;;  %v1679_v24 = vpack.i.bf16 %v601_v22, %v599_v21 }
 0x173   : > { %1685 = vrot.lane.b32.xlu1 %v1684_v23, %s2216_s23  ;;  %1680 = vrot.lane.b32.xlu0 %v1679_v24, %s2215_s24  ;;  %s431_s23 = sand.u32 1, %s1779_s26  }
 0x174   : > { %s1383_s24 = scalar_lea.sflag [#allocation3], %s431_s23 }
 0x1e5   : > { %v1686_v25 = vpop.permute.xlu1 %1685  ;;  %v1681_v26 = vpop.permute.xlu0 %1680 }
 0x1e6   : > { %v1688_v27 = vunpack.i.h.bf16 %v1686_v25  ;;  %v1687_v28 = vunpack.i.l.bf16 %v1686_v25  ;;  %v1683_v29 = vunpack.i.h.bf16 %v1681_v26  ;;  %v1682_v30 = vunpack.i.l.bf16 %v1681_v26 }
 0x1e8   : > { %v621_v31 = vsel %vm619_vm12, %v589_v13, %v1683_v29  ;;  %v620_v32 = vsel %vm619_vm12, %v593_v9, %v1682_v30 }
 0x1e9   : > { %v623_v33 = vsel %vm622_vm13, %v620_v32, %v1687_v28  ;;  %v624_v34 = vsel %vm622_vm13, %v621_v31, %v1688_v27 }
 0x1ea   : > { %v625_v35 = vpack.c.bf16 %v624_v34, %v623_v33 }
 0x1ec   : > { %1559 = vmatmul.mubr.msk.bf16.vlgmr.msra.gmra.mxu1 %vm681_vm14, %v625_v35 }
 0x2ac   : > { %v719_v47 = vpop.f32.mrf.mxu1 }
 0x2ad   : > { %v720_v48 = vadd.f32 %v1460_v46, %v719_v47 }
 0x2ae   : > { %v1560_v50 = vpop.f32.mrf.mxu1 }
 0x2af   : > { %v726_v51 = vmax.f32 %v720_v48, 0.0  ;;  %v1702_v48 = vld [vmem:[%s2206_s5] sm:$0xff]  }
 0x2b0   : > { %v722_v52 = vpop.f32.mrf.mxu1  ;;  %1573 = vmatpush3.bf16.msra.mxu0 %v1702_v48 }
 0x2b1   : > { %v730_v53 = vcombine.high %v726_v51, %v726_v51  ;;  %v737_v54 = vrot.slane %v726_v51, %v2014_v49  ;;  %v723_v55 = vadd.f32 %v1460_v46, %v722_v52  ;;  %1578 = vmatprep.subr.bf16.mxu0 %v1789_v1 }
 0x2b2   : > { %v1561_v56 = vpop.f32.mrf.mxu1 }
 0x2b3   : > { %v744_v57 = vrot.slane %v730_v53, %v2014_v49  ;;  %v745_v58 = vcombine.high %v737_v54, %v737_v54  ;;  %v773_v59 = vsel %vm772_vm15, %v737_v54, -inf  ;;  %v727_v60 = vmax.f32 %v723_v55, 0.0 }
 0x2b4   : > { %v774_v61 = vrot.slane %v773_v59, 4 }
 0x2b5   : > { %v746_v62 = vcombine.high %v744_v57, %v744_v57  ;;  %v780_v63 = vsel %vm772_vm15, %v745_v58, -inf  ;;  %v787_v0 = vsel %vm772_vm15, %v744_v57, -inf  ;;  %v747_v2 = vcombine.high %v727_v60, %v727_v60 }
 0x2b6   : > { %v775_v3 = vmax.f32 %v773_v59, %v774_v61  ;;  %v781_v4 = vrot.slane %v780_v63, 4  ;;  %v788_v5 = vrot.slane %v787_v0, 4  ;;  %v754_v6 = vrot.slane %v727_v60, %v2014_v49 }
 0x2b7   : > { %v794_v7 = vsel %vm772_vm15, %v746_v62, -inf  ;;  %v761_v8 = vrot.slane %v747_v2, %v2014_v49 }
 0x2b8   : > { %v776_v9 = vrot.slane %v775_v3, 2  ;;  %v782_v10 = vmax.f32 %v780_v63, %v781_v4  ;;  %v789_v11 = vmax.f32 %v787_v0, %v788_v5  ;;  %v795_v12 = vrot.slane %v794_v7, 4 }
 0x2b9   : > { %v762_v13 = vcombine.high %v754_v6, %v754_v6  ;;  %v763_v14 = vcombine.high %v761_v8, %v761_v8  ;;  %v801_v15 = vsel %vm772_vm15, %v754_v6, -inf  ;;  %v815_v16 = vsel %vm772_vm15, %v761_v8, -inf }
 0x2ba   : > { %v777_v17 = vmax.f32 %v775_v3, %v776_v9  ;;  %v783_v18 = vrot.slane %v782_v10, 2  ;;  %v790_v19 = vrot.slane %v789_v11, 2  ;;  %v796_v20 = vmax.f32 %v794_v7, %v795_v12 }
 0x2bb   : > { %v802_v21 = vrot.slane %v801_v15, 4  ;;  %v808_v22 = vsel %vm772_vm15, %v762_v13, -inf  ;;  %v816_v23 = vrot.slane %v815_v16, 4  ;;  %v822_v24 = vsel %vm772_vm15, %v763_v14, -inf }
 0x2bc   : > { %v778_v25 = vrot.slane %v777_v17, 1  ;;  %v784_v26 = vmax.f32 %v782_v10, %v783_v18  ;;  %v791_v27 = vmax.f32 %v789_v11, %v790_v19  ;;  %v797_v28 = vrot.slane %v796_v20, 2  ;;  %v1704_v19 = vld [vmem:[%s2208_s7 + $0x30] sm:$0xff]  }
 0x2bd   : > { %v803_v29 = vmax.f32 %v801_v15, %v802_v21  ;;  %v809_v30 = vrot.slane %v808_v22, 4  ;;  %v817_v31 = vmax.f32 %v815_v16, %v816_v23  ;;  %v823_v32 = vrot.slane %v822_v24, 4  ;;  %v1706_v21 = vld [vmem:[%s2208_s7 + $0x20] sm:$0xff]   ;;  %v1708_v23 = vld [vmem:[%s2208_s7 + $0x10] sm:$0xff]  }
 0x2be   : > { %v785_v33 = vrot.slane %v784_v26, 1  ;;  %v792_v34 = vrot.slane %v791_v27, 1  ;;  %v798_v35 = vmax.f32 %v796_v20, %v797_v28  ;;  %v779_v40 = vmax.f32 %v777_v17, %v778_v25  ;;  %v1703_v17 = vld [vmem:[%s2208_s7 + $0x38] sm:$0xff]   ;;  %v1705_v20 = vld [vmem:[%s2208_s7 + $0x28] sm:$0xff]   ;;  %v1710_v25 = vld [vmem:[%s2208_s7] sm:$0xff]  }
 0x2bf   : > { %v804_v36 = vrot.slane %v803_v29, 2  ;;  %v810_v37 = vmax.f32 %v808_v22, %v809_v30  ;;  %v818_v38 = vrot.slane %v817_v31, 2  ;;  %v824_v39 = vmax.f32 %v822_v24, %v823_v32  ;;  %v1707_v22 = vld [vmem:[%s2208_s7 + $0x18] sm:$0xff]   ;;  %v1709_v24 = vld [vmem:[%s2208_s7 + $0x8] sm:$0xff]  }
 0x2c0   : > { %v786_v41 = vmax.f32 %v784_v26, %v785_v33  ;;  %v793_v42 = vmax.f32 %v791_v27, %v792_v34  ;;  %v799_v43 = vrot.slane %v798_v35, 1  ;;  %v1798_v18 = vmov 0   ;;  %v1711_v26 = vld [vmem:[%s2208_s7 + $0x58] sm:$0xff]   ;;  %v1712_v27 = vld [vmem:[%s2208_s7 + $0x50] sm:$0xff]   ;;  %v1713_v28 = vld [vmem:[%s2208_s7 + $0x48] sm:$0xff]  }
 0x2c1   : > { %v805_v44 = vmax.f32 %v803_v29, %v804_v36  ;;  %v811_v45 = vrot.slane %v810_v37, 2  ;;  %v819_v46 = vmax.f32 %v817_v31, %v818_v38  ;;  %v825_v47 = vrot.slane %v824_v39, 2  ;;  %1146 = vmatprep.subr.bf16.mxu1 %v1798_v18  ;;  %v1468_v29 = vld [vmem:[%s2207_s6] ss:$0 sm:$0xff] }
 0x2c2   : > { %v800_v50 = vmax.f32 %v798_v35, %v799_v43  ;;  %v838_v51 = vsel %vm837_vm0, %v786_v41, %v779_v40  ;;  %1147 = vmatpush1.bf16.msra.mxu1 %v1703_v17 }
 0x2c3   : > { %v840_v52 = vsel %vm839_vm6, %v793_v42, %v838_v51  ;;  %v806_v53 = vrot.slane %v805_v44, 1  ;;  %v812_v54 = vmax.f32 %v810_v37, %v811_v45  ;;  %v820_v55 = vrot.slane %v819_v46, 1  ;;  %1148 = vmatprep.subr.bf16.mxu1 %v1798_v18 }
 0x2c4   : > { %v826_v56 = vmax.f32 %v824_v39, %v825_v47  ;;  %v842_v57 = vsel %vm841_vm7, %v800_v50, %v840_v52 }
 0x2c5   : > { %v807_v58 = vmax.f32 %v805_v44, %v806_v53  ;;  %v813_v59 = vrot.slane %v812_v54, 1  ;;  %v821_v60 = vmax.f32 %v819_v46, %v820_v55 }
 0x2c6   : > { %v827_v61 = vrot.slane %v826_v56, 1  ;;  %1149 = vmatpush1.bf16.msra.mxu1 %v1704_v19 }
 0x2c7   : > { %v814_v62 = vmax.f32 %v812_v54, %v813_v59  ;;  %v844_v63 = vsel %vm843_vm8, %v807_v58, %v842_v57  ;;  %1150 = vmatprep.subr.bf16.mxu1 %v1798_v18 }
 0x2c8   : > { %v828_v0 = vmax.f32 %v826_v56, %v827_v61 }
 0x2c9   : > { %v846_v2 = vsel %vm845_vm9, %v814_v62, %v844_v63 }
 0x2ca   : > { %v848_v3 = vsel %vm847_vm10, %v821_v60, %v846_v2  ;;  %v852_v4 = vsel %vm586_vm11, %v828_v0, 0.0  ;;  %1151 = vmatpush1.bf16.msra.mxu1 %v1705_v20  ;;  %v1715_v2 = vld [vmem:[%s2210_s9 + $0x38] sm:$0xff]  }
 0x2cb   : > { %v851_v5 = vsel %vm586_vm11, 0.0, %v848_v3  ;;  %v862_v6 = vrot.slane %v852_v4, 2  ;;  %v856_v7 = vrot.slane %v852_v4, 1  ;;  %1152 = vmatprep.subr.bf16.mxu1 %v1798_v18 }
 0x2cc   : > { %v861_v8 = vrot.slane %v851_v5, 2  ;;  %v855_v9 = vrot.slane %v851_v5, 1 }
 0x2ce   : > { %v863_v10 = vsel %vm466_vm3, %v861_v8, %v862_v6  ;;  %v857_v11 = vsel %vm454_vm1, %v855_v9, %v856_v7  ;;  %1153 = vmatpush1.bf16.msra.mxu1 %v1706_v21  ;;  %vm991_vm1 = vcmask 517120   ;;  %v1716_v7 = vld [vmem:[%s2210_s9 + $0x30] sm:$0xff]   ;;  %v1718_v21 = vld [vmem:[%s2210_s9 + $0x20] sm:$0xff]  }
 0x2cf   : > { %864 = vrot.lane.b32.xlu1 %v863_v10, %s2226_s21  ;;  %858 = vrot.lane.b32.xlu0 %v857_v11, %s2227_s22  ;;  %s432_s22 = scalar_lea.vmem [#allocation2], %s431_s23 }
 0x2d0   : > { %1154 = vmatprep.subr.bf16.mxu1 %v1798_v18  ;;  %s1395_s30 = sshll.u32 %s432_s22, 4  ;;  %s2162_s30 = int_to_ptr.vmem [resolvable:$true] %s1395_s30 }
 0x2d1   : > { %s1727_s29 = scalar_lea.vmem %s2162_s30, 16  ;;  %p1734_p0 = scmp.lt.s32.totalorder %s2162_s30, %s1732_s1 }
 0x2d2   : > { %1155 = vmatpush1.bf16.msra.mxu1 %v1707_v22  ;;  %v1719_v22 = vld [vmem:[%s2210_s9 + $0x18] sm:$0xff]   ;;  %p1728_p11 = scmp.ne.s32.totalorder %s2162_s30, %s1727_s29  ;;  %p1735_p1 = scmp.lt.s32.totalorder %s1733_s15, %s1727_s29 }
 0x2d3   : > { %1156 = vmatprep.subr.bf16.mxu1 %v1798_v18 }
 0x2d4   : > { %p1729_p12 = pnand %p1728_p11, %p1908_p5  ;;  %p1736_p2 = por %p1735_p1, %p1734_p0 }
 0x2d6   : > { %1157 = vmatpush1.bf16.msra.mxu1 %v1708_v23  ;;  %v1720_v23 = vld [vmem:[%s2210_s9 + $0x10] sm:$0xff]   ;;  %p1730_p13 = pneg %p1729_p12 }
 0x2d7   : > { %1158 = vmatprep.subr.bf16.mxu1 %v1798_v18 }
 0x2d8   : > { %p1737_p3 = pnand %p1736_p2, %p1730_p13 }
 0x2da   : > { %1159 = vmatpush1.bf16.msra.mxu1 %v1709_v24  ;;  %v1721_v24 = vld [vmem:[%s2210_s9 + $0x8] sm:$0xff]  }
 0x2db   : > { %1160 = vmatprep.subr.bf16.mxu1 %v1798_v18 }
 0x2de   : > { %1161 = vmatpush1.bf16.msra.mxu1 %v1710_v25  ;;  %v1722_v25 = vld [vmem:[%s2210_s9] sm:$0xff]  }
 0x2df   : > { %1170 = vmatprep.subr.bf16.mxu1 %v1798_v18 }
 0x2e2   : > { %1171 = vmatpush2.bf16.msra.mxu1 %v1711_v26  ;;  %v1476_v26 = vld [vmem:[%s2209_s8] ss:$0 sm:$0xff] }
 0x2e3   : > { %1172 = vmatprep.subr.bf16.mxu1 %v1798_v18 }
 0x2e6   : > { %1173 = vmatpush2.bf16.msra.mxu1 %v1712_v27 }
 0x2e7   : > { %1174 = vmatprep.subr.bf16.mxu1 %v1798_v18 }
 0x2ea   : > { %1175 = vmatpush2.bf16.msra.mxu1 %v1713_v28 }
 0x2eb   : > { %1176 = vmatprep.subr.bf16.mxu1 %v1798_v18 }
 0x341   : > { %v865_v12 = vpop.permute.xlu1 %864  ;;  %v859_v13 = vpop.permute.xlu0 %858 }
 0x342   : > { %v867_v14 = vsel %vm619_vm12, %v851_v5, %v859_v13  ;;  %v1717_v13 = vld [vmem:[%s2210_s9 + $0x28] sm:$0xff]  }
 0x343   : > { %v868_v15 = vsel %vm622_vm13, %v867_v14, %v865_v12 }
 0x344   : > { %v869_v16 = vpack.c.bf16 %v868_v15, %v868_v15 }
 0x346   : > { %1575 = vmatmul.mubr.msk.bf16.vlgmr.msra.gmra.mxu0 %vm681_vm14, %v869_v16 }
 0x347   : > { %1594 = vmatprep.mubr.msk.bf16.mxu0 %vm1792_vm5, %v1789_v1  ;;  %1579 = vmatpush3.bf16.msra.mxu0 %v1715_v2 }
 0x348   : > { %1580 = vmatprep.subr.bf16.mxu0 %v1789_v1 }
 0x34b   : > { %1581 = vmatpush3.bf16.msra.mxu0 %v1716_v7 }
 0x34c   : > { %1582 = vmatprep.subr.bf16.mxu0 %v1789_v1 }
 0x34f   : > { %1583 = vmatpush3.bf16.msra.mxu0 %v1717_v13 }
 0x350   : > { %1584 = vmatprep.subr.bf16.mxu0 %v1789_v1 }
 0x353   : > { %1585 = vmatpush3.bf16.msra.mxu0 %v1718_v21 }
 0x354   : > { %1586 = vmatprep.subr.bf16.mxu0 %v1789_v1 }
 0x357   : > { %1587 = vmatpush3.bf16.msra.mxu0 %v1719_v22 }
 0x358   : > { %1588 = vmatprep.subr.bf16.mxu0 %v1789_v1 }
 0x35b   : > { %1589 = vmatpush3.bf16.msra.mxu0 %v1720_v23 }
 0x35c   : > { %1590 = vmatprep.subr.bf16.mxu0 %v1789_v1 }
 0x35f   : > { %1591 = vmatpush3.bf16.msra.mxu0 %v1721_v24 }
 0x360   : > { %1592 = vmatprep.subr.bf16.mxu0 %v1789_v1 }
 0x363   : > { %1593 = vmatpush3.bf16.msra.mxu0 %v1722_v25 }
 0x364   : > { %1598 = vmatprep.subr.bf16.mxu0 %v1789_v1 }
 0x406   : > { %v962_v30 = vpop.f32.mrf.mxu0 }
 0x407   : > { %v963_v31 = vadd.f32 %v1468_v29, %v962_v30 }
 0x408   : > { %v1576_v32 = vpop.f32.mrf.mxu0 }
 0x409   : > { %v968_v33 = vmax.f32 %v963_v31, 0.0 }
 0x40a   : > { %v965_v34 = vpop.f32.mrf.mxu0 }
 0x40b   : > { %v970_v35 = vcombine.high %v968_v33, %v968_v33  ;;  %v977_v36 = vrot.slane %v968_v33, %v2014_v49 }
 0x40c   : > { %v1577_v37 = vpop.f32.mrf.mxu0 }
 0x40d   : > { %v984_v38 = vrot.slane %v970_v35, %v2014_v49  ;;  %v985_v39 = vcombine.high %v977_v36, %v977_v36  ;;  %v992_v40 = vsel %vm991_vm1, %v977_v36, -inf  ;;  %v1714_v49 = vld [vmem:[%s2208_s7 + $0x40] sm:$0xff]  }
 0x40e   : > { %v993_v41 = vrot.slane %v992_v40, 4  ;;  %1177 = vmatpush2.bf16.msra.mxu1 %v1714_v49 }
 0x40f   : > { %v986_v42 = vcombine.high %v984_v38, %v984_v38  ;;  %v999_v43 = vsel %vm991_vm1, %v985_v39, -inf  ;;  %v1006_v44 = vsel %vm991_vm1, %v984_v38, -inf }
 0x410   : > { %v994_v45 = vmax.f32 %v992_v40, %v993_v41  ;;  %v1000_v46 = vrot.slane %v999_v43, 4  ;;  %v1007_v47 = vrot.slane %v1006_v44, 4  ;;  %v1723_v41 = vld [vmem:[%s2212_s11 + $0x18] sm:$0xff]  }
 0x411   : > { %v1013_v48 = vsel %vm991_vm1, %v986_v42, -inf }
 0x412   : > { %v995_v50 = vrot.slane %v994_v45, 2  ;;  %v1001_v51 = vmax.f32 %v999_v43, %v1000_v46  ;;  %v1008_v52 = vmax.f32 %v1006_v44, %v1007_v47  ;;  %v1014_v53 = vrot.slane %v1013_v48, 4  ;;  %v1724_v43 = vld [vmem:[%s2212_s11 + $0x10] sm:$0xff]   ;;  %v1725_v44 = vld [vmem:[%s2212_s11 + $0x8] sm:$0xff]   ;;  %v1213_v46 = vld [vmem:[%s2211_s10] sm:$0x1] }
 0x414   : > { %v996_v54 = vmax.f32 %v994_v45, %v995_v50  ;;  %v1002_v55 = vrot.slane %v1001_v51, 2  ;;  %v1009_v56 = vrot.slane %v1008_v52, 2  ;;  %v1015_v57 = vmax.f32 %v1013_v48, %v1014_v53  ;;  %v1726_v45 = vld [vmem:[%s2212_s11] sm:$0xff]  }
 0x416   : > { %v997_v58 = vrot.slane %v996_v54, 1  ;;  %v1003_v59 = vmax.f32 %v1001_v51, %v1002_v55  ;;  %v1010_v60 = vmax.f32 %v1008_v52, %v1009_v56  ;;  %v1016_v61 = vrot.slane %v1015_v57, 2 }
 0x418   : > { %v1004_v62 = vrot.slane %v1003_v59, 1  ;;  %v1011_v63 = vrot.slane %v1010_v60, 1  ;;  %v1017_v0 = vmax.f32 %v1015_v57, %v1016_v61  ;;  %v998_v3 = vmax.f32 %v996_v54, %v997_v58 }
 0x41a   : > { %v1005_v4 = vmax.f32 %v1003_v59, %v1004_v62  ;;  %v1012_v5 = vmax.f32 %v1010_v60, %v1011_v63  ;;  %v1018_v6 = vrot.slane %v1017_v0, 1 }
 0x41c   : > { %v1019_v8 = vmax.f32 %v1017_v0, %v1018_v6  ;;  %v1024_v9 = vsel %vm837_vm0, %v1005_v4, %v998_v3 }
 0x41d   : > { %v1025_v10 = vsel %vm839_vm6, %v1012_v5, %v1024_v9 }
 0x41e   : > { %v1026_v11 = vsel %vm841_vm7, %v1019_v8, %v1025_v10 }
 0x41f   : > { %v1028_v12 = vsel %vm586_vm11, 0.0, %v1026_v11 }
 0x420   : > { %v1029_v14 = vsel %vm478_vm2, %v1028_v12, 0.0  ;;  %vm1380_vm2 = vcmask 8192  }
 0x421   : > { %v1031_v15 = vrot.slane %v1029_v14, 1  ;;  %v1035_v16 = vrot.slane %v1029_v14, 2 }
 0x423   : > { %1032 = vrot.lane.b32.xlu0 %v1031_v15, %s2226_s21  ;;  %v1039_v17 = vpack.c.bf16 %v1035_v16, %v1035_v16  ;;  %s2160_s21 = scalar_lea.hbm %s2214_s13, %s1503_s0 }
 0x425   : > { %1489 = vmatprep.mubr.msk.bf16.mxu1 %vm622_vm13, %v1039_v17 }
 0x495   : > { %v1033_v18 = vpop.permute.xlu0 %1032 }
 0x496   : > { %v1037_v19 = vsel %vm622_vm13, %v1029_v14, %v1033_v18 }
 0x497   : > { %v1038_v20 = vpack.c.bf16 %v1037_v19, %v1037_v19 }
 0x499   : > { %1179 = vmatmul.mubr.bf16.vlgmr.msra.gmra.mxu1 %v1038_v20 }
 0x559   : > { %v1180_v27 = vpop.f32.mrf.mxu1 }
 0x55a   : > { %v1181_v28 = vadd.f32 %v1476_v26, %v1180_v27 }
 0x55b   : > { %v1182_v29 = vpop.f32.mrf.mxu1 }
 0x55c   : > { %v1186_v30 = vmax.f32 %v1181_v28, 0.0 }
 0x55d   : > { %v1183_v31 = vpop.f32.mrf.mxu1 }
 0x55e   : > { %v1187_v32 = vsel %vm490_vm4, %v1186_v30, 0.0 }
 0x55f   : > { %v1188_v33 = vrot.slane %v1187_v32, 4  ;;  %v1184_v34 = vpop.f32.mrf.mxu1 }
 0x561   : > { %v1189_v35 = vadd.f32 %v1188_v33, %v1187_v32 }
 0x563   : > { %v1190_v36 = vrot.slane %v1189_v35, 2 }
 0x565   : > { %v1191_v37 = vadd.f32 %v1190_v36, %v1189_v35 }
 0x567   : > { %v1192_v38 = vrot.slane %v1191_v37, 1 }
 0x569   : > { %v1193_v39 = vadd.f32 %v1192_v38, %v1191_v37 }
 0x56b   : > { %v1195_v40 = vmul.f32 0.25, %v1193_v39 }
 0x56d   : > { %v1196_v42 = vpack.c.bf16 %v1195_v40, %v1195_v40 }
 0x56f   : > { %1595 = vmatmul.mubr.bf16.vlgmr.msra.gmra.mxu0 %v1196_v42 }
 0x570   : > { %1599 = vmatpush3.bf16.msra.mxu0 %v1723_v41  ;;  %1606 = vmatprep.mubr.msk.bf16.mxu0 %vm1792_vm5, %v1789_v1 }
 0x571   : > { %1600 = vmatprep.subr.bf16.mxu0 %v1789_v1 }
 0x574   : > { %1601 = vmatpush3.bf16.msra.mxu0 %v1724_v43 }
 0x575   : > { %1602 = vmatprep.subr.bf16.mxu0 %v1789_v1 }
 0x578   : > { %1603 = vmatpush3.bf16.msra.mxu0 %v1725_v44 }
 0x579   : > { %1604 = vmatprep.subr.bf16.mxu0 %v1789_v1  ;;  %v1312_v1 = vld [vmem:[%s2213_s12] sm:$0x1] }
 0x57c   : > { %1605 = vmatpush3.bf16.msra.mxu0 %v1726_v45 }
 0x62f   : > { %v1296_v47 = vpop.f32.mrf.mxu0 }
 0x630   : > { %v1297_v48 = vadd.f32 %v1296_v47, %v1213_v46 }
 0x631   : > { %v1596_v50 = vpop.f32.mrf.mxu0 }
 0x632   : > { %v1302_v51 = vmax.f32 %v1297_v48, 0.0 }
 0x633   : > { %v1299_v52 = vpop.f32.mrf.mxu0 }
 0x634   : > { %v1303_v53 = vpack.c.bf16 %v1302_v51, %v1302_v51 }
 0x635   : > { %v1597_v54 = vpop.f32.mrf.mxu0 }
 0x636   : > { %1607 = vmatmul.mubr.msk.bf16.vlgmr.msra.gmra.mxu0 %vm622_vm13, %v1303_v53 }
 0x6f6   : > { %v1374_v55 = vpop.f32.mrf.mxu0 }
 0x6f7   : > { %v1375_v56 = vadd.f32 %v1374_v55, %v1312_v1 }
 0x6f8   : > { %v1608_v57 = vpop.f32.mrf.mxu0 }
 0x6f9   : > { %1381 = vst.msk [vmem:[%s432_s22] sm:$0x1] %vm1380_vm2, %v1375_v56 }
 0x6fa   : > { %v1377_v49 = vpop.f32.mrf.mxu0 }
 0x6fb   : > { %1740 = shalt.err (!%p1737_p3)
}
 0x6fc   : > { %s1741_s0 = scalar_lea.hbm %s2160_s21, 16  ;;  %s1745_s16 = scalar_lea.hbm %s2214_s13, 32 }
 0x6fd   : > { %p1742_p4 = scmp.ne.s32.totalorder %s2160_s21, %s1741_s0  ;;  %p1746_p9 = scmp.lt.s32.totalorder %s2160_s21, %s2214_s13 }
 0x6fe   : > { %p1747_p10 = scmp.lt.s32.totalorder %s1745_s16, %s1741_s0 }
 0x6ff   : > { %p1743_p7 = pnand %p1742_p4, %p1908_p5 }
 0x700   : > { %p1748_p11 = por %p1747_p10, %p1746_p9 }
 0x701   : > { %p1744_p8 = pneg %p1743_p7 }
 0x703   : > { %p1749_p12 = pnand %p1748_p11, %p1744_p8 }
 0x705   : > { %1752 = shalt.err (!%p1749_p12)
}
 0x706   : > { %1610 = dma.vmem_to_hbm [thread:$0]  (%p1908_p5), %s2162_s30, 16, %s2160_s21, %s1383_s24   ;;  %v1609_v58 = vpop.f32.mrf.mxu0 }
 0x707 PF: > { %p1616_p13 = scmp.ge.s32.totalorder %s1787_s28, 2  ;;  %s1407_s1 = sand.u32 1, %s1775_s25  }
 0x708   : > { %s1408_s2 = scalar_lea.sflag [#allocation3], %s1407_s1 }
 0x709   : > { %p1613_p0 = pnand %p1616_p13, %p1912_p6 }
 0x70b   : > { %p1614_p1 = pneg %p1613_p0 }
 0x70d   : > { %1770 = dma.done.wait (%p1614_p1), %s1408_s2, 16  }
 0x70e   : > { %1772 = vsyncadd (%p1614_p1), %s1408_s2, 4294967280  ;;  %p23_p2 = scmp.ge.s32.totalorder %s1895_s14, 4   ;;  %s2228_s25 = smov %s1779_s26 }
 0x70f   : > { %s2229_s26 = smov %s1783_s27  ;;  %s2230_s27 = smov %s1906_s17 }
 0x710   : > { %s2231_s28 = smov %s1895_s14  ;;  %25 = sbr.rel (!%p23_p2) target bundleno = 7 (0x7), region = 107 }
 0x715   :  { %1412 = vsyncpa [#allocation3], 1 }
 0x716   :  { %1414 = vsyncpa [#allocation3 + $0x1], 1 }

</bundles_post_ra>
